<compile_context>
chip_gen: v7x
topology: tpu7x:2x2x1
jax: 0.10.0
libtpu: 0.0.40
codegen_flags: <defaults>
</compile_context>

<pallas_src>
import functools

import jax
import jax.numpy as jnp
from jax import lax
from jax.experimental import pallas as pl
from jax.experimental.pallas import tpu as pltpu

EPS = 1e-12


# --------------------------------------------------------------------------
# VMEM budget (generation aware)
# --------------------------------------------------------------------------
def _vmem_budget_bytes():
    try:
        cap = int(pltpu.get_tpu_info().vmem_capacity_bytes)
    except Exception:
        cap = 64 * 1024 * 1024          # v7x per-TensorCore (most restrictive)
    budget = int(cap * 0.55)            # tile-picker budget: headroom for the
                                        # un-modeled temporaries + compiler scratch
    limit = int(cap * 0.80)             # vmem_limit_bytes passed to Mosaic
    return budget, limit


# --------------------------------------------------------------------------
# Kernel 1: power iteration -> inv_sigma (1,1), u_new, v_new
#   Grid-less pallas_call: the weight lives in VMEM exactly once (no pipeline
#   double-buffer), and 1/sigma is computed here so the conv epilogue is a mul.
# --------------------------------------------------------------------------
def _sn_kernel(power_iterations, w_ref, u_ref, v_ref, isig_ref, u_out_ref, v_out_ref):
    w = w_ref[...].astype(jnp.float32)          # (Hd, Wd) = (Cout, Cin*KH*KW)
    u = u_ref[...].astype(jnp.float32)          # (1, Hd)
    v = v_ref[...].astype(jnp.float32)          # (1, Wd)

    if power_iterations == 0:
        wv = lax.dot_general(v, w, (((1,), (1,)), ((), ())),
                             preferred_element_type=jnp.float32)          # (1, Hd)
    else:
        wv = None
        for _ in range(power_iterations):
            # v = l2normalize(W^T u)      (rsqrt -> EUP slot)
            wtu = jnp.dot(u, w, preferred_element_type=jnp.float32)       # (1, Wd)
            v = wtu * lax.rsqrt(jnp.sum(wtu * wtu) + EPS * EPS)
            # u = l2normalize(W v)        (W v reused below for sigma)
            wv = lax.dot_general(v, w, (((1,), (1,)), ((), ())),
                                 preferred_element_type=jnp.float32)      # (1, Hd)
            u = wv * lax.rsqrt(jnp.sum(wv * wv) + EPS * EPS)

    sigma = jnp.sum(u * wv)                      # u . (W v)
    isig_ref[...] = jnp.reshape(1.0 / sigma, (1, 1))
    u_out_ref[...] = u.astype(u_out_ref.dtype)
    v_out_ref[...] = v.astype(v_out_ref.dtype)


def spectral_norm_inv_sigma(w2d, u, v, power_iterations=1):
    """Returns (inv_sigma (1,1) f32, u_new (Hd,), v_new (Wd,))."""
    Hd, Wd = w2d.shape
    kernel = functools.partial(_sn_kernel, power_iterations)
    isig, u_new, v_new = pl.pallas_call(
        kernel,
        out_shape=[jax.ShapeDtypeStruct((1, 1), jnp.float32),
                   jax.ShapeDtypeStruct((1, Hd), jnp.float32),
                   jax.ShapeDtypeStruct((1, Wd), jnp.float32)],
    )(w2d, u.reshape(1, Hd), v.reshape(1, Wd))
    return isig, u_new.reshape(Hd), v_new.reshape(Wd)


# --------------------------------------------------------------------------
# Kernel 2: Conv2d (stride 1) with inv_sigma folded into the epilogue.
#   Activations: NCHW, spatially padded and flattened to (N, Cin, (Hp+1)*Wp).
#   Each grid step (n, r) DMAs one row-slab (all channels, (TH+KH)*Wp lanes)
#   into a double-buffered VMEM scratch; the KH*KW taps are contiguous lane
#   slices of that slab -> KH*KW matmuls (Cout, Cin)@(Cin, TH*Wp), accumulated
#   in f32, scaled by 1/sigma, biased, lane-compacted to (Cout, TH*W_out) and
#   stored lane-dense into the NCHW-flat output.
# --------------------------------------------------------------------------
def _conv_kernel(KH, KW, TH, Wp, W_out,
                 x_hbm, w_ref, b_ref, isig_ref, o_ref, xbuf, sem):
    n = pl.program_id(0)
    r = pl.program_id(1)
    R = pl.num_programs(1)
    MM = TH * Wp                       # matmul N dim (includes KW-1 pad columns/row)
    SLAB = xbuf.shape[2]               # (TH + KH) * Wp
    slot = r % 2

    def issue(rr, slot_):
        pltpu.make_async_copy(
            x_hbm.at[n, :, pl.ds(rr * MM, SLAB)],     # (Cin, SLAB) contiguous rows
            xbuf.at[slot_],
            sem.at[slot_],
        ).start()

    # Re-prime at r == 0 so each image's prefetch chain is self-contained:
    # a megacore split over the (parallel) batch axis stays correct.
    @pl.when(r == 0)
    def _prime():
        issue(r, slot)

    @pl.when(r + 1 < R)
    def _prefetch():
        issue(r + 1, 1 - slot)

    pltpu.make_async_copy(
        x_hbm.at[n, :, pl.ds(0, SLAB)], xbuf.at[slot], sem.at[slot]
    ).wait()

    xb = xbuf.at[slot]                                  # Ref view (Cin, SLAB)

    # KH*KW shifted-window matmuls: no im2col concat/reshape; the MXU N dimension
    # is the large TH*Wp, Cout sits in the sublane dim.  (For Cin >= 128 each tap
    # already fills the MXU contraction depth.)
    acc = None
    for kh in range(KH):
        for kw in range(KW):
            off = kh * Wp + kw                          # static lane offset
            rhs = xb[:, off:off + MM]                   # (Cin, MM)
            part = jnp.dot(w_ref[kh * KW + kw], rhs,
                           preferred_element_type=jnp.float32)   # (Cout, MM)
            acc = part if acc is None else acc + part

    # Epilogue: spectral normalization (multiply by precomputed 1/sigma from SMEM)
    # and bias; no divide, no normalized weight ever materialized in HBM.
    inv_sigma = isig_ref[0, 0]
    out = acc * inv_sigma + b_ref[...]                  # (Cout, MM) + (Cout, 1)

    # Drop the KW-1 padded columns per output row -> lane-dense (Cout, TH*W_out).
    if Wp == W_out:
        out_c = out
    else:
        out_c = jnp.concatenate(
            [out[:, h * Wp:h * Wp + W_out] for h in range(TH)], axis=1)
    o_ref[...] = out_c.astype(o_ref.dtype)


def _pick_row_tile(H_out, W_out, Wp, Cin, Cout, KH, KW, itemsize, budget_bytes):
    """Largest divisor of H_out that (a) keeps the output block lane-dense
    (TH*W_out % 128 == 0, or TH == H_out so the block is the full dim) and
    (b) fits the VMEM budget.  Sublane padding is dtype-aware."""
    def rup(n, m):
        return -(-n // m) * m

    sub = {4: 8, 2: 16, 1: 32}.get(itemsize, 8)
    cands = [th for th in range(1, H_out + 1)
             if H_out % th == 0 and ((th * W_out) % 128 == 0 or th == H_out)]
    best = None
    for th in cands:
        slab = (th + KH) * Wp
        mm = th * Wp
        xbuf = 2 * rup(Cin, sub) * rup(slab, 128) * itemsize        # dbl-buffered slab
        obuf = 2 * rup(Cout, 8) * rup(th * W_out, 128) * itemsize   # pipelined output
        accb = rup(Cout, 8) * rup(mm, 128) * 4                      # f32 accumulator
        taps = 2 * rup(Cin, sub) * rup(mm, 128) * itemsize          # shifted-slice temps
        comp = rup(Cout, 8) * rup(th * W_out, 128) * 4              # compaction staging
        wbuf = 2 * KH * KW * rup(Cout, 8) * rup(Cin, 128) * itemsize
        if xbuf + obuf + accb + taps + comp + wbuf <= budget_bytes:
            if best is None or th > best:
                best = th
    if best is None:
        best = min(cands)       # best effort at extreme shapes
    return best


def conv2d_sn_nchw(x_flat, w_taps, bias, inv_sigma,
                   N, Cin, Cout, H_out, W_out, Wp, KH, KW, row_tile, vmem_limit,
                   out_dtype):
    TH = row_tile
    R = H_out // TH
    SLAB = (TH + KH) * Wp

    kernel = functools.partial(_conv_kernel, KH, KW, TH, Wp, W_out)
    return pl.pallas_call(
        kernel,
        grid=(N, R),
        in_specs=[
            pl.BlockSpec(memory_space=pl.ANY),                         # x_flat (manual DMA)
            pl.BlockSpec((KH * KW, Cout, Cin), lambda n, r: (0, 0, 0)),  # per-tap weights
            pl.BlockSpec((Cout, 1), lambda n, r: (0, 0)),               # bias
            pl.BlockSpec(memory_space=pltpu.MemorySpace.SMEM),          # inv_sigma (1,1)
        ],
        out_specs=pl.BlockSpec((pl.Squeezed(), Cout, TH * W_out),
                               lambda n, r: (n, 0, r)),
        out_shape=jax.ShapeDtypeStruct((N, Cout, H_out * W_out), out_dtype),
        scratch_shapes=[
            pltpu.VMEM((2, Cin, SLAB), x_flat.dtype),    # double-buffered row slab
            pltpu.SemaphoreType.DMA((2,)),
        ],
        compiler_params=pltpu.CompilerParams(
            dimension_semantics=("parallel", "arbitrary"),
            vmem_limit_bytes=vmem_limit,
        ),
    )(x_flat, w_taps, bias, inv_sigma)


# --------------------------------------------------------------------------
# Functional forward (jit-safe): returns (y, u_new, v_new)
# --------------------------------------------------------------------------
def spectral_norm_conv2d_forward(x_nchw, w_bar, bias, u, v,
                                 power_iterations=1, padding=1, row_tile=None):
    Cout, Cin, KH, KW = w_bar.shape
    N, Cin2, H, W = x_nchw.shape
    assert Cin2 == Cin
    H_out = H + 2 * padding - KH + 1
    W_out = W + 2 * padding - KW + 1
    Wp = W + 2 * padding

    w2d = w_bar.reshape(Cout, Cin * KH * KW)
    inv_sigma, u_new, v_new = spectral_norm_inv_sigma(w2d, u, v, power_iterations)

    # Per-tap weights (KH*KW, Cout, Cin): element (kh*KW+kw, co, ci) = w_bar[co, ci, kh, kw].
    w_taps = jnp.transpose(w_bar, (2, 3, 0, 1)).reshape(KH * KW, Cout, Cin)

    # NCHW stays native.  Zero-pad spatially (+1 extra bottom row so the last
    # row-slab DMA and the shifted lane windows stay in bounds) and flatten
    # (Hp+1, Wp) into a single lane axis (free metadata reshape, no transpose).
    # TODO(synk): fold this zero-padding into the kernel's DMA.
    x_pad = jnp.pad(x_nchw, ((0, 0), (0, 0),
                             (padding, padding + 1), (padding, padding)))
    x_flat = x_pad.reshape(N, Cin, (H + 2 * padding + 1) * Wp)

    budget, vmem_limit = _vmem_budget_bytes()
    if row_tile is None:
        row_tile = _pick_row_tile(H_out, W_out, Wp, Cin, Cout, KH, KW,
                                  jnp.dtype(x_nchw.dtype).itemsize, budget)
    assert H_out % row_tile == 0, "row_tile must divide the output height"
    assert (row_tile * W_out) % 128 == 0 or row_tile == H_out, \
        "lane-dense output block needs row_tile*W_out % 128 == 0 (or row_tile == H_out)"

    y_flat = conv2d_sn_nchw(
        x_flat, w_taps, bias.reshape(Cout, 1).astype(jnp.float32), inv_sigma,
        N, Cin, Cout, H_out, W_out, Wp, KH, KW, row_tile, vmem_limit,
        x_nchw.dtype)

    y = y_flat.reshape(N, Cout, H_out, W_out)        # free metadata reshape
    return y, u_new, v_new


# --------------------------------------------------------------------------
# SpectralNorm(Conv2d) module equivalent
# --------------------------------------------------------------------------
class SpectralNormConv2d:
    """SpectralNorm(nn.Conv2d(in_ch, out_ch, k, stride=1, padding=1))."""

    def __init__(self, key, in_ch, out_ch, ksize=3, power_iterations=1,
                 padding=1, row_tile=None):
        k1, k2, k3, k4 = jax.random.split(key, 4)
        self.w_bar = 0.1 * jax.random.normal(
            k1, (out_ch, in_ch, ksize, ksize), jnp.float32)          # OIHW
        self.bias = 0.1 * jax.random.normal(k2, (out_ch,), jnp.float32)
        height = out_ch
        width = in_ch * ksize * ksize
        u = jax.random.normal(k3, (height,), jnp.float32)
        v = jax.random.normal(k4, (width,), jnp.float32)
        self.u = u / (jnp.linalg.norm(u) + EPS)
        self.v = v / (jnp.linalg.norm(v) + EPS)
        self.power_iterations = power_iterations
        self.padding = padding
        self.row_tile = row_tile

    def __call__(self, x_nchw):
        y, u_new, v_new = spectral_norm_conv2d_forward(
            x_nchw, self.w_bar, self.bias, self.u, self.v,
            self.power_iterations, self.padding, self.row_tile)
        # Mirror the PyTorch buffer update (use the functional forward under jit).
        self.u, self.v = u_new, v_new
        return y


# --------------------------------------------------------------------------
# Pure-JAX reference (for correctness check)
# --------------------------------------------------------------------------
def reference_forward(x, w_bar, bias, u, v, power_iterations=1):
    Cout = w_bar.shape[0]
    w2d = w_bar.reshape(Cout, -1)
    for _ in range(power_iterations):
        v = w2d.T @ u
        v = v / (jnp.linalg.norm(v) + EPS)
        wu = w2d @ v
        u = wu / (jnp.linalg.norm(wu) + EPS)
    sigma = u @ (w2d @ v)
    w = w_bar / sigma
    y = lax.conv_general_dilated(x, w, (1, 1), ((1, 1), (1, 1)),
                                 dimension_numbers=('NCHW', 'OIHW', 'NCHW'))
    return y + bias[None, :, None, None]


if __name__ == "__main__":
    key = jax.random.PRNGKey(0)
    kx, kp = jax.random.split(key)

    N, Cin, H, W = 2, 4, 16, 16
    Cout, ksize = 8, 3

    x = jax.random.normal(kx, (N, Cin, H, W), jnp.float32)

    # row_tile=8 -> 2 row tiles per image: exercises the double-buffered DMA,
    # the per-image re-priming, and the lane compaction (TH*W_out = 128 lanes).
    mod = SpectralNormConv2d(kp, Cin, Cout, ksize, power_iterations=1, row_tile=8)
    u0, v0 = mod.u, mod.v  # snapshot buffers before the forward updates them

    y = mod(x)
    y = jax.block_until_ready(y)

    y_ref = reference_forward(x, mod.w_bar, mod.bias, u0, v0, power_iterations=1)
    assert y.shape == (N, Cout, H, W)
    assert jnp.allclose(y, y_ref, rtol=1e-4, atol=1e-4), "mismatch vs reference"

    print("KERNEL_OK")
</pallas_src>

<mosaic_0001>
module attributes {stable_mosaic.version = 11 : i64} {
  func.func @_sn_kernel(%arg0: memref<8x36xf32, #tpu.memory_space<vmem>>, %arg1: memref<1x8xf32, #tpu.memory_space<vmem>>, %arg2: memref<1x36xf32, #tpu.memory_space<vmem>>, %arg3: memref<1x1xf32, #tpu.memory_space<vmem>>, %arg4: memref<1x8xf32, #tpu.memory_space<vmem>>, %arg5: memref<1x36xf32, #tpu.memory_space<vmem>>) attributes {dimension_semantics = [], scalar_prefetch = 0 : i64, scratch_operands = 0 : i64, tpu.core_type = #tpu.core_type<tc>} {
    %c0 = arith.constant 0 : index
    %c0_0 = arith.constant 0 : index
    %0 = vector.load %arg0[%c0, %c0_0] : memref<8x36xf32, #tpu.memory_space<vmem>>, vector<8x36xf32>
    %c0_1 = arith.constant 0 : index
    %c0_2 = arith.constant 0 : index
    %1 = vector.load %arg1[%c0_1, %c0_2] : memref<1x8xf32, #tpu.memory_space<vmem>>, vector<1x8xf32>
    %cst = arith.constant dense<0.000000e+00> : vector<1x36xf32>
    %2 = tpu.matmul %1, %0, %cst {dimension_numbers = #tpu.dot_dimension_numbers<[1], [0], [0], [1], [0, 0, 1, 1], [], []>} : vector<1x8xf32>, vector<8x36xf32>, vector<1x36xf32> -> vector<1x36xf32>
    %3 = arith.mulf %2, %2 : vector<1x36xf32>
    %4 = vector.shape_cast %3 : vector<1x36xf32> to vector<1x1x36xf32>
    %cst_3 = arith.constant dense<0.000000e+00> : vector<1xf32>
    %5 = vector.multi_reduction <add>, %4, %cst_3 [1, 2] : vector<1x1x36xf32> to vector<1xf32>
    %6 = vector.shape_cast %5 : vector<1xf32> to vector<1x1x1xf32>
    %7 = vector.extract %6[0, 0, 0] : f32 from vector<1x1x1xf32>
    %cst_4 = arith.constant 1.000000e-24 : f32
    %8 = arith.addf %7, %cst_4 : f32
    %9 = math.rsqrt %8 : f32
    %10 = vector.broadcast %9 : f32 to vector<1x36xf32>
    %11 = arith.mulf %2, %10 : vector<1x36xf32>
    %cst_5 = arith.constant dense<0.000000e+00> : vector<1x8xf32>
    %12 = tpu.matmul %11, %0, %cst_5 {dimension_numbers = #tpu.dot_dimension_numbers<[1], [1], [0], [0], [0, 0, 1, 0], [], []>} : vector<1x36xf32>, vector<8x36xf32>, vector<1x8xf32> -> vector<1x8xf32>
    %13 = arith.mulf %12, %12 : vector<1x8xf32>
    %14 = vector.shape_cast %13 : vector<1x8xf32> to vector<1x1x8xf32>
    %cst_6 = arith.constant dense<0.000000e+00> : vector<1xf32>
    %15 = vector.multi_reduction <add>, %14, %cst_6 [1, 2] : vector<1x1x8xf32> to vector<1xf32>
    %16 = vector.shape_cast %15 : vector<1xf32> to vector<1x1x1xf32>
    %17 = vector.extract %16[0, 0, 0] : f32 from vector<1x1x1xf32>
    %cst_7 = arith.constant 1.000000e-24 : f32
    %18 = arith.addf %17, %cst_7 : f32
    %19 = math.rsqrt %18 : f32
    %20 = vector.broadcast %19 : f32 to vector<1x8xf32>
    %21 = arith.mulf %12, %20 : vector<1x8xf32>
    %22 = arith.mulf %21, %12 : vector<1x8xf32>
    %23 = vector.shape_cast %22 : vector<1x8xf32> to vector<1x1x8xf32>
    %cst_8 = arith.constant dense<0.000000e+00> : vector<1xf32>
    %24 = vector.multi_reduction <add>, %23, %cst_8 [1, 2] : vector<1x1x8xf32> to vector<1xf32>
    %25 = vector.shape_cast %24 : vector<1xf32> to vector<1x1x1xf32>
    %26 = vector.extract %25[0, 0, 0] : f32 from vector<1x1x1xf32>
    %cst_9 = arith.constant 1.000000e+00 : f32
    %27 = arith.divf %cst_9, %26 : f32
    %28 = vector.broadcast %27 : f32 to vector<1x1xf32>
    %c0_10 = arith.constant 0 : index
    %c0_11 = arith.constant 0 : index
    %29 = vector.load %arg3[%c0_10, %c0_11] : memref<1x1xf32, #tpu.memory_space<vmem>>, vector<1x1xf32>
    tpu.vector_store %arg3[%c0_10, %c0_11], %28 {strides = array<i32>} : memref<1x1xf32, #tpu.memory_space<vmem>>, vector<1x1xf32>,
    %c0_12 = arith.constant 0 : index
    %c0_13 = arith.constant 0 : index
    %30 = vector.load %arg4[%c0_12, %c0_13] : memref<1x8xf32, #tpu.memory_space<vmem>>, vector<1x8xf32>
    tpu.vector_store %arg4[%c0_12, %c0_13], %21 {strides = array<i32>} : memref<1x8xf32, #tpu.memory_space<vmem>>, vector<1x8xf32>,
    %c0_14 = arith.constant 0 : index
    %c0_15 = arith.constant 0 : index
    %31 = vector.load %arg5[%c0_14, %c0_15] : memref<1x36xf32, #tpu.memory_space<vmem>>, vector<1x36xf32>
    tpu.vector_store %arg5[%c0_14, %c0_15], %11 {strides = array<i32>} : memref<1x36xf32, #tpu.memory_space<vmem>>, vector<1x36xf32>,
    return
  }
}

</mosaic_0001>

<bundles_post_ra>
// kernel: tpu_custom_call.1
= control target key start
LH: loop header
LB: loop body
LE: loop exit
PB: predicated region body
PF: predicated region fallthrough
CT: control target
= control target key end

     0   :  { %11 = vsyncpa [#allocation3], 0  ;;  %s510_s0 = inlined_call_operand.hbm [shape: f32[8,36], index: 0, kind: input, shape index: {}]   ;;  %s511_s1 = inlined_call_operand.vmem [shape: f32[1,8], index: 1, kind: input, shape index: {}]   ;;  %s512_s2 = inlined_call_operand.vmem [shape: f32[1,36], index: 2, kind: input, shape index: {}]   ;;  %s513_s3 = inlined_call_operand.hbm [shape: f32[1,1], index: 3, kind: output, shape index: {0}]   ;;  %s514_s4 = inlined_call_operand.hbm [shape: f32[1,8], index: 4, kind: output, shape index: {1}]   ;;  %s515_s5 = inlined_call_operand.hbm [shape: f32[1,36], index: 5, kind: output, shape index: {2}]  }
   0x1   :  { %12 = vsyncpa [#allocation4], 0 }
   0x2   :  { %13 = vsyncpa [#allocation7], 0  ;;  %s416_s18 = smov [#allocation2]   ;;  %s322_s22 = scalar_lea.hbm %s510_s0, 128 }
   0x3   :  { %s20_s19 = sshll.u32 %s416_s18, 4  ;;  %p323_p0 = scmp.ne.s32.totalorder %s510_s0, %s322_s22  ;;  %s21_s19 = int_to_ptr.vmem [resolvable:$true] %s20_s19 }
   0x4   :  { %p326_p1 = scmp.lt.u32.totalorder %s322_s22, %s510_s0 }
   0x6   :  { %p328_p2 = pnand %p326_p1, %p323_p0 }
   0x8   :  { %331 = shalt.err (!%p328_p2)
}
   0x9   :  { %s332_s26 = scalar_lea.vmem %s21_s19, 128  ;;  %p337_p4 = scmp.lt.s32.totalorder %s21_s19, %s21_s19 }
   0xa   :  { %p333_p3 = scmp.ne.s32.totalorder %s21_s19, %s332_s26  ;;  %p338_p5 = scmp.lt.s32.totalorder %s332_s26, %s332_s26 }
   0xc   :  { %p339_p6 = por %p338_p5, %p337_p4 }
   0xe   :  { %p340_p7 = pnand %p339_p6, %p333_p3 }
  0x10   :  { %343 = shalt.err (!%p340_p7)
}
  0x11   :  { %23 = dma.hbm_to_vmem [thread:$0]  %s510_s0, 128, %s21_s19, [#allocation3]  }
  0x12   :  { %410 = dma.done.wait [#allocation3], 128  }
  0x13   :  { %411 = vsyncadd [#allocation3], 4294967168  ;;  %v417_v0 = vmov 0.0   ;;  %vm418_vm0 = vmmov 0   ;;  %vm33_vm1 = vcmask 64512   ;;  %v31_v1 = vld [vmem:[#allocation2] sm:$0xff] }
  0x14   :  { %288 = vmatprep.subr.mxu0 %v417_v0  ;;  %290 = vmatprep.mubr.msk.f32.mxu0 %vm418_vm0, %v417_v0  ;;  %v32_v2 = vld [vmem:[%s511_s1] sm:$0x1]  ;;  %vm108_vm2 = vcmask 286720   ;;  %vm125_vm3 = vcmask 293888   ;;  %vm203_vm4 = vcmask 57344   ;;  %s419_s10 = smov [#allocation6]  }
  0x15   :  { %293 = vmatprep.subr.mxu1 %v417_v0  ;;  %295 = vmatprep.mubr.msk.f32.mxu1 %vm418_vm0, %v417_v0  ;;  %s255_s11 = sshll.u32 %s419_s10, 4  ;;  %s256_s11 = int_to_ptr.vmem [resolvable:$true] %s255_s11 }
  0x16   :  { %289 = vmatpush3.msra.mxu0 %v31_v1  ;;  %294 = vmatpush3.xpose.msk.msra.mxu1 %vm125_vm3, %v31_v1  ;;  %s344_s12 = scalar_lea.vmem %s256_s11, 16  ;;  %s348_s13 = scalar_lea.vmem %s256_s11, 32 }
  0x17   :  { %291 = vmatmul.mubr.msk.f32.vlgmr.msra.gmra.mrb[0].mxu0 %vm33_vm1, %v32_v2  ;;  %p345_p8 = scmp.ne.s32.totalorder %s256_s11, %s344_s12  ;;  %p349_p9 = scmp.lt.s32.totalorder %s256_s11, %s256_s11 }
  0x18   :  { %p350_p10 = scmp.lt.s32.totalorder %s348_s13, %s344_s12 }
  0x1a   :  { %p351_p11 = por %p350_p10, %p349_p9 }
  0x1c   :  { %p352_p12 = pnand %p351_p11, %p345_p8 }
  0xea   :  { %v103_v3 = vpop.f32.mrb[0].mxu0 }
  0xeb   :  { %v292_v4 = vpop.f32.mrb[1].mxu0  ;;  %v107_v5 = vmul.f32 %v103_v3, %v103_v3 }
  0xed   :  { %v109_v6 = vsel %vm108_vm2, %v107_v5, 0.0 }
  0xee   :  { %110 = vadd.xlane.f32.xlu0 %v109_v6 }
 0x17b   :  { %v111_v7 = vpop.xlane.xlu0 %110 }
 0x17c   :  { %v112_v8 = vrot.slane %v111_v7, 4 }
 0x17e   :  { %v113_v9 = vadd.f32 %v112_v8, %v111_v7 }
 0x180   :  { %v114_v10 = vrot.slane %v113_v9, 2 }
 0x182   :  { %v115_v11 = vadd.f32 %v114_v10, %v113_v9 }
 0x184   :  { %v116_v12 = vrot.slane %v115_v11, 1 }
 0x186   :  { %v117_v13 = vadd.f32 %v116_v12, %v115_v11 }
 0x188   :  { %298 = vpush %v117_v13 }
 0x1b9   :  { %s299_s0 = spop %298 }
 0x1ba   :  { %s119_s1 = sadd.f32 1e-24, %s299_s0 }
 0x1bc   :  { %v120_v14 = vstv %s119_s1 }
 0x1bd   :  { %316 = vrsqrt.f32 %v120_v14 }
 0x1c7   :  { %v317_v15 = vpop.eup %316 }
 0x1c8   :  { %300 = vpush %v317_v15 }
 0x1f9   :  { %s301_s6 = spop %300 }
 0x1fa   :  { %v123_v16 = vstv %s301_s6 }
 0x1fb   :  { %v124_v17 = vmul.f32 %v123_v16, %v103_v3 }
 0x1fd   :  { %238 = vst.msk [vmem:[#allocation8] sm:$0x1] %vm108_vm2, %v124_v17  ;;  %296 = vmatmul.mubr.msk.f32.vlgmr.msra.gmra.mrb[0].mxu1 %vm125_vm3, %v124_v17 }
 0x2d0   :  { %v198_v18 = vpop.f32.mrb[0].mxu1 }
 0x2d1   :  { %v297_v19 = vpop.f32.mrb[1].mxu1  ;;  %v202_v20 = vmul.f32 %v198_v18, %v198_v18 }
 0x2d3   :  { %v204_v21 = vsel %vm203_vm4, %v202_v20, 0.0 }
 0x2d4   :  { %205 = vadd.xlane.f32.xlu0 %v204_v21 }
 0x361   :  { %v206_v22 = vpop.xlane.xlu0 %205 }
 0x362   :  { %v207_v23 = vrot.slane %v206_v22, 4 }
 0x364   :  { %v208_v24 = vadd.f32 %v207_v23, %v206_v22 }
 0x366   :  { %v209_v25 = vrot.slane %v208_v24, 2 }
 0x368   :  { %v210_v26 = vadd.f32 %v209_v25, %v208_v24 }
 0x36a   :  { %v211_v27 = vrot.slane %v210_v26, 1 }
 0x36c   :  { %v212_v28 = vadd.f32 %v211_v27, %v210_v26 }
 0x36e   :  { %302 = vpush %v212_v28 }
 0x39f   :  { %s303_s7 = spop %302 }
 0x3a0   :  { %s214_s8 = sadd.f32 1e-24, %s303_s7 }
 0x3a2   :  { %v215_v29 = vstv %s214_s8 }
 0x3a3   :  { %318 = vrsqrt.f32 %v215_v29 }
 0x3ad   :  { %v319_v30 = vpop.eup %318 }
 0x3ae   :  { %304 = vpush %v319_v30 }
 0x3df   :  { %s305_s9 = spop %304 }
 0x3e0   :  { %v218_v31 = vstv %s305_s9 }
 0x3e1   :  { %v219_v32 = vmul.f32 %v218_v31, %v198_v18 }
 0x3e3   :  { %237 = vst.msk [vmem:[#allocation6] sm:$0x1] %vm203_vm4, %v219_v32  ;;  %v220_v33 = vmul.f32 %v219_v32, %v198_v18 }
 0x3e5   :  { %v221_v34 = vsel %vm203_vm4, %v220_v33, 0.0 }
 0x3e6   :  { %222 = vadd.xlane.f32.xlu1 %v221_v34 }
 0x3e7   :  { %355 = shalt.err (!%p352_p12)
}
 0x3e8   :  { %s356_s16 = scalar_lea.hbm %s514_s4, 16 }
 0x3e9   :  { %p357_p13 = scmp.ne.s32.totalorder %s514_s4, %s356_s16  ;;  %p360_p0 = scmp.lt.u32.totalorder %s356_s16, %s514_s4 }
 0x3eb   :  { %p362_p1 = pnand %p360_p0, %p357_p13 }
 0x3ed   :  { %365 = shalt.err (!%p362_p1)
}
 0x3ee   :  { %258 = dma.vmem_to_hbm [thread:$0]  %s256_s11, 16, %s514_s4, [#allocation7]  }
 0x3ef   :  { %s420_s2 = smov [#allocation8]  }
 0x3f0   :  { %s265_s23 = sshll.u32 %s420_s2, 4  ;;  %s266_s23 = int_to_ptr.vmem [resolvable:$true] %s265_s23 }
 0x3f1   :  { %s366_s24 = scalar_lea.vmem %s266_s23, 16  ;;  %s370_s25 = scalar_lea.vmem %s266_s23, 32 }
 0x3f2   :  { %p367_p2 = scmp.ne.s32.totalorder %s266_s23, %s366_s24  ;;  %p371_p3 = scmp.lt.s32.totalorder %s266_s23, %s266_s23 }
 0x3f3   :  { %p372_p4 = scmp.lt.s32.totalorder %s370_s25, %s366_s24 }
 0x3f5   :  { %p373_p5 = por %p372_p4, %p371_p3 }
 0x3f7   :  { %p374_p6 = pnand %p373_p5, %p367_p2 }
 0x473   :  { %v223_v35 = vpop.xlane.xlu1 %222 }
 0x474   :  { %v224_v36 = vrot.slane %v223_v35, 4 }
 0x475   :  { %377 = shalt.err (!%p374_p6)
}
 0x476   :  { %s378_s28 = scalar_lea.hbm %s515_s5, 16 }
 0x477   :  { %p379_p7 = scmp.ne.s32.totalorder %s515_s5, %s378_s28  ;;  %p382_p8 = scmp.lt.u32.totalorder %s378_s28, %s515_s5 }
 0x479   :  { %p384_p9 = pnand %p382_p8, %p379_p7 }
 0x47b   :  { %387 = shalt.err (!%p384_p9)
}
 0x47c   :  { %268 = dma.vmem_to_hbm [thread:$0]  %s266_s23, 16, %s515_s5, [#allocation7]   ;;  %v225_v37 = vadd.f32 %v224_v36, %v223_v35  ;;  %vm235_vm5 = vcmask 0  }
 0x47d   :  { %s421_s8 = smov [#allocation5]  }
 0x47e   :  { %v226_v38 = vrot.slane %v225_v37, 2  ;;  %s245_s9 = sshll.u32 %s421_s8, 4  ;;  %s246_s9 = int_to_ptr.vmem [resolvable:$true] %s245_s9 }
 0x47f   :  { %s388_s11 = scalar_lea.vmem %s246_s9, 16  ;;  %s392_s5 = scalar_lea.vmem %s246_s9, 32 }
 0x480   :  { %v227_v39 = vadd.f32 %v226_v38, %v225_v37  ;;  %p389_p10 = scmp.ne.s32.totalorder %s246_s9, %s388_s11  ;;  %p393_p11 = scmp.lt.s32.totalorder %s246_s9, %s246_s9 }
 0x481   :  { %p394_p12 = scmp.lt.s32.totalorder %s392_s5, %s388_s11 }
 0x482   :  { %v228_v40 = vrot.slane %v227_v39, 1 }
 0x483   :  { %p395_p13 = por %p394_p12, %p393_p11 }
 0x484   :  { %v229_v41 = vadd.f32 %v228_v40, %v227_v39 }
 0x485   :  { %p396_p0 = pnand %p395_p13, %p389_p10 }
 0x486   :  { %306 = vpush %v229_v41 }
 0x4b7   :  { %s307_s7 = spop %306 }
 0x4b8   :  { %v231_v42 = vstv %s307_s7 }
 0x4b9   :  { %320 = vrcp.f32 %v231_v42 }
 0x4c3   :  { %v321_v43 = vpop.eup %320 }
 0x4c4   :  { %308 = vpush %v321_v43 }
 0x4f5   :  { %s309_s10 = spop %308 }
 0x4f6   :  { %v234_v44 = vstv %s309_s10 }
 0x4f7   :  { %236 = vst.msk [vmem:[#allocation5] sm:$0x1] %vm235_vm5, %v234_v44 }
 0x4f8   :  { %399 = shalt.err (!%p396_p0)
}
 0x4f9   :  { %s400_s14 = scalar_lea.hbm %s513_s3, 16 }
 0x4fa   :  { %p401_p1 = scmp.ne.s32.totalorder %s513_s3, %s400_s14  ;;  %p404_p2 = scmp.lt.u32.totalorder %s400_s14, %s513_s3 }
 0x4fc   :  { %p406_p3 = pnand %p404_p2, %p401_p1 }
 0x4fe   :  { %409 = shalt.err (!%p406_p3)
}
 0x4ff   :  { %248 = dma.vmem_to_hbm [thread:$0]  %s246_s9, 16, %s513_s3, [#allocation4]  }
 0x500   :  { %412 = dma.done.wait [#allocation4], 16  }
 0x501   :  { %413 = vsyncadd [#allocation4], 4294967280 }
 0x502   :  { %414 = dma.done.wait [#allocation7], 32  }
 0x503   :  { %415 = vsyncadd [#allocation7], 4294967264 }
 0x504   :  { %278 = vsyncpa [#allocation3], 1 }
 0x505   :  { %279 = vsyncpa [#allocation4], 1 }
 0x506   :  { %280 = vsyncpa [#allocation7], 1 }

</bundles_post_ra>
